<compile_context>
chip_gen: v5e
topology: v5e:2x2
jax: 0.10.0
libtpu: 0.0.40
codegen_flags: <defaults>
</compile_context>

<pallas_src>
import functools

import jax
import jax.numpy as jnp
from jax import lax
from jax.experimental import pallas as pl
from jax.experimental.pallas import tpu as pltpu


_CPARAMS = pltpu.CompilerParams(
    dimension_semantics=("parallel",),
    vmem_limit_bytes=32 * 1024 * 1024,
)


# ----------------------------------------------------------------------------
# Host-side helpers (layout plumbing, not compute)
# ----------------------------------------------------------------------------

def _edge_masks(H, W, reps):
    """(9, reps*H*W) f32 0/1 masks: tap t valid at pixel p of each image."""
    pos = jnp.arange(H * W)
    row, col = pos // W, pos % W
    rows = []
    for t in range(9):
        oy, ox = t // 3 - 1, t % 3 - 1
        rows.append((row + oy >= 0) & (row + oy < H)
                    & (col + ox >= 0) & (col + ox < W))
    m = jnp.stack(rows, axis=0).astype(jnp.float32)            # (9, HW)
    return jnp.tile(m, (1, reps))                              # (9, reps*HW)


def _pack_conv_weights(w_hwio, cpad):
    """(3,3,Cin,Cout) -> (Cout, 9*cpad) bf16, columns ordered [tap, channel]."""
    kh, kw, cin, cout = w_hwio.shape
    w = jnp.transpose(w_hwio, (0, 1, 3, 2)).reshape(kh * kw, cout, cin)
    w = jnp.pad(w, ((0, 0), (0, 0), (0, cpad - cin)))          # (9, Cout, cpad)
    w = jnp.transpose(w, (1, 0, 2)).reshape(cout, kh * kw * cpad)
    return w.astype(jnp.bfloat16)


def init_gen_params(key, cin=3, cc=8, cs=8, cpad=8):
    """Synthetic generator ('self.gen') parameters, pre-packed for the kernel."""
    ks = jax.random.split(key, 4)
    w_content = 0.1 * jax.random.normal(ks[0], (3, 3, cin, cc), jnp.float32)
    w_style = 0.1 * jax.random.normal(ks[1], (3, 3, cin, cs), jnp.float32)
    # Content & style encoder branches fused along Cout.
    w_enc = jnp.concatenate([w_content, w_style], axis=-1)     # (3,3,cin,cc+cs)
    w_mlp = 0.1 * jax.random.normal(ks[2], (cs, 2 * cc), jnp.float32)
    b_mlp = jnp.concatenate([jnp.ones((cc,)), jnp.zeros((cc,))]
                            ).astype(jnp.float32).reshape(2 * cc, 1)
    w_dec = 0.1 * jax.random.normal(ks[3], (3, 3, cc, cin), jnp.float32)
    return {
        "w_enc": _pack_conv_weights(w_enc, cpad),              # (cc+cs, 9*cpad) bf16
        "b_enc": jnp.zeros((cc + cs, 1), jnp.float32),
        "w_mlp_t": jnp.transpose(w_mlp).astype(jnp.bfloat16),  # (2cc, cs) bf16
        "b_mlp": b_mlp,                                        # (2cc, 1) f32
        "w_dec": _pack_conv_weights(w_dec, cc),                # (cin, 9*cc) bf16
        "b_dec": jnp.zeros((cin, 1), jnp.float32),
    }


# ----------------------------------------------------------------------------
# In-kernel helpers
# ----------------------------------------------------------------------------

def _conv3x3(x, w_ref, masks, bias, W, N):
    """3x3 'same' conv as ONE stacked-K matmul.

    x     : (Cp, N) f32 channel-major activations, N = 2*H*W lanes (pair)
    w_ref : Ref (Cout, 9*Cp) bf16, columns ordered [tap, channel]
    masks : (9, N) f32 precomputed 0/1 edge masks
    bias  : (Cout, 1) f32
    """
    taps = []
    for t in range(9):
        oy, ox = t // 3 - 1, t % 3 - 1
        d = oy * W + ox
        xt = x if d == 0 else pltpu.roll(x, shift=(-d) % N, axis=1)
        if d != 0:
            xt = xt * masks[t:t + 1, :]        # zero 'same' padding + seam bleed
        taps.append(xt)
    stacked = jnp.concatenate(taps, axis=0).astype(jnp.bfloat16)   # (9*Cp, N)
    out = jnp.dot(w_ref[...], stacked, preferred_element_type=jnp.float32)
    return out + bias


# ----------------------------------------------------------------------------
# Fused encode + style-swap + decode kernel (one pair per grid step)
# ----------------------------------------------------------------------------

def _fused_pair_kernel(x_ref, mask_ref, wenc_ref, benc_ref, wmlp_ref,
                       bmlp_ref, wdec_ref, bdec_ref, oab_ref, oba_ref,
                       *, H, W, cc):
    HW = H * W
    N = 2 * HW
    x = x_ref[0]                               # (cpad, N) f32, lanes = [img_a | img_b]
    masks = mask_ref[...]                      # (9, N) f32

    # ---- encode: conv3x3 + bias + ReLU (single MXU matmul, K=72) ----------
    feat = jnp.maximum(_conv3x3(x, wenc_ref, masks, benc_ref[...], W, N), 0.0)
    c_all = feat[:cc, :]                       # content features (cc, N)
    s_all = feat[cc:, :]                       # style features   (cs, N)

    # ---- style MLP (pooling pushed past the linear map) -------------------
    # mean_p(W @ S) == W @ mean_p(S): lane-dense MXU op, no (cs,1) matvec.
    g_map = jnp.dot(wmlp_ref[...], s_all.astype(jnp.bfloat16),
                    preferred_element_type=jnp.float32)            # (2cc, N)
    gb_a = jnp.mean(g_map[:, HW:], axis=1, keepdims=True) + bmlp_ref[...]  # style(b)->a
    gb_b = jnp.mean(g_map[:, :HW], axis=1, keepdims=True) + bmlp_ref[...]  # style(a)->b

    # ---- AdaIN: per-image instance-norm stats, styles swapped in VMEM -----
    c_a, c_b = c_all[:, :HW], c_all[:, HW:]
    mean_a = jnp.mean(c_a, axis=1, keepdims=True)
    mean_b = jnp.mean(c_b, axis=1, keepdims=True)
    rstd_a = lax.rsqrt(jnp.mean((c_a - mean_a) ** 2, axis=1, keepdims=True) + 1e-5)
    rstd_b = lax.rsqrt(jnp.mean((c_b - mean_b) ** 2, axis=1, keepdims=True) + 1e-5)
    in_b = lax.broadcasted_iota(jnp.int32, (1, N), 1) >= HW
    mean = jnp.where(in_b, mean_b, mean_a)
    rstd = jnp.where(in_b, rstd_b, rstd_a)
    gamma = jnp.where(in_b, gb_b[:cc], gb_a[:cc])
    beta = jnp.where(in_b, gb_b[cc:], gb_a[cc:])
    mod = gamma * (c_all - mean) * rstd + beta                      # (cc, N) f32

    # ---- decode: conv3x3 + bias + tanh (single MXU matmul, K=72) ----------
    out = jnp.tanh(_conv3x3(mod, wdec_ref, masks, bdec_ref[...], W, N))
    oab_ref[0] = out[:, :HW].astype(oab_ref.dtype)   # content a + style b
    oba_ref[0] = out[:, HW:].astype(oba_ref.dtype)   # content b + style a


# ----------------------------------------------------------------------------
# TrainerBase pipeline wrappers
# ----------------------------------------------------------------------------

def mix_decompositions(source, target):
    """Plain-JAX 1:1 port of TrainerBase._mix_decompositions (API parity;
    the fused forward below performs this swap inside the kernel)."""
    out = {k: v for k, v in source.items() if k != "style"}
    if source["content"].shape[0] != target["style"].shape[0]:
        assert target["style"].shape[0] == 1
        out["style"] = jnp.broadcast_to(
            target["style"],
            (source["content"].shape[0],) + target["style"].shape[1:])
    else:
        out["style"] = target["style"]
    return out


def swap_decompositions(dec_a, dec_b):
    return mix_decompositions(dec_a, dec_b), mix_decompositions(dec_b, dec_a)


def trainer_forward(params, images_a, images_b):
    """encode(a), encode(b) -> swap styles -> decode(ab), decode(ba), fused
    into a single pallas_call with one (a_i, b_i) pair per grid step."""
    assert images_a.shape == images_b.shape
    B, Cin, H, W = images_a.shape
    HW = H * W
    Ctot, k_enc = params["w_enc"].shape
    cpad = k_enc // 9
    cc = params["w_mlp_t"].shape[0] // 2
    cs = params["w_mlp_t"].shape[1]
    cout = params["w_dec"].shape[0]
    assert cc + cs == Ctot and params["w_dec"].shape[1] == 9 * cc and Cin <= cpad

    # Layout plumbing: pad channels to cpad (8-aligned tap groups) and stack
    # the (a, b) pair along the lane axis -> lane-dense N = 2*HW columns.
    def prep(imgs):
        x = imgs.reshape(B, Cin, HW).astype(jnp.float32)
        return jnp.pad(x, ((0, 0), (0, cpad - Cin), (0, 0)))

    x_pair = jnp.concatenate([prep(images_a), prep(images_b)], axis=-1)  # (B,cpad,2HW)
    masks = _edge_masks(H, W, 2)                                         # (9, 2HW)

    x_ab, x_ba = pl.pallas_call(
        functools.partial(_fused_pair_kernel, H=H, W=W, cc=cc),
        out_shape=(jax.ShapeDtypeStruct((B, cout, HW), jnp.float32),
                   jax.ShapeDtypeStruct((B, cout, HW), jnp.float32)),
        grid=(B,),
        in_specs=[
            pl.BlockSpec((1, cpad, 2 * HW), lambda i: (i, 0, 0)),   # paired images
            pl.BlockSpec((9, 2 * HW), lambda i: (0, 0)),            # edge masks
            pl.BlockSpec((Ctot, 9 * cpad), lambda i: (0, 0)),       # w_enc
            pl.BlockSpec((Ctot, 1), lambda i: (0, 0)),              # b_enc
            pl.BlockSpec((2 * cc, cs), lambda i: (0, 0)),           # w_mlp_t
            pl.BlockSpec((2 * cc, 1), lambda i: (0, 0)),            # b_mlp
            pl.BlockSpec((cout, 9 * cc), lambda i: (0, 0)),         # w_dec
            pl.BlockSpec((cout, 1), lambda i: (0, 0)),              # b_dec
        ],
        out_specs=(pl.BlockSpec((1, cout, HW), lambda i: (i, 0, 0)),
                   pl.BlockSpec((1, cout, HW), lambda i: (i, 0, 0))),
        compiler_params=_CPARAMS,
    )(x_pair, masks, params["w_enc"], params["b_enc"], params["w_mlp_t"],
      params["b_mlp"], params["w_dec"], params["b_dec"])

    return x_ab.reshape(B, cout, H, W), x_ba.reshape(B, cout, H, W)


# ----------------------------------------------------------------------------

if __name__ == "__main__":
    key = jax.random.PRNGKey(0)
    k_a, k_b, k_p = jax.random.split(key, 3)

    # Small shapes: batch=2, channels=3 (RGB), spatial=16x16 (NCHW like PyTorch).
    images_a = jax.random.normal(k_a, (2, 3, 16, 16), jnp.float32)
    images_b = jax.random.normal(k_b, (2, 3, 16, 16), jnp.float32)
    params = init_gen_params(k_p)

    fwd = jax.jit(trainer_forward)
    x_ab, x_ba = fwd(params, images_a, images_b)
    jax.block_until_ready((x_ab, x_ba))

    assert x_ab.shape == images_a.shape and x_ba.shape == images_b.shape
    assert bool(jnp.all(jnp.isfinite(x_ab))) and bool(jnp.all(jnp.isfinite(x_ba)))
    print("KERNEL_OK")
</pallas_src>

<mosaic_0001>
module attributes {stable_mosaic.version = 11 : i64} {
  func.func @_fused_pair_kernel(%arg0: i32, %arg1: memref<1x8x512xf32, #tpu.memory_space<vmem>>, %arg2: memref<9x512xf32, #tpu.memory_space<vmem>>, %arg3: memref<16x72xbf16, #tpu.memory_space<vmem>>, %arg4: memref<16x1xf32, #tpu.memory_space<vmem>>, %arg5: memref<16x8xbf16, #tpu.memory_space<vmem>>, %arg6: memref<16x1xf32, #tpu.memory_space<vmem>>, %arg7: memref<3x72xbf16, #tpu.memory_space<vmem>>, %arg8: memref<3x1xf32, #tpu.memory_space<vmem>>, %arg9: memref<1x3x256xf32, #tpu.memory_space<vmem>>, %arg10: memref<1x3x256xf32, #tpu.memory_space<vmem>>) attributes {dimension_semantics = [#tpu.dimension_semantics<parallel>], iteration_bounds = array<i64: 2>, scalar_prefetch = 0 : i64, scratch_operands = 0 : i64, tpu.core_type = #tpu.core_type<tc>, window_params = [{transform_indices = @transform_0, window_bounds = array<i64: 1, 8, 512>}, {pipeline_mode = #tpu.pipeline_mode<synchronous>, transform_indices = @transform_1, window_bounds = array<i64: 9, 512>}, {pipeline_mode = #tpu.pipeline_mode<synchronous>, transform_indices = @transform_2, window_bounds = array<i64: 16, 72>}, {pipeline_mode = #tpu.pipeline_mode<synchronous>, transform_indices = @transform_3, window_bounds = array<i64: 16, 1>}, {pipeline_mode = #tpu.pipeline_mode<synchronous>, transform_indices = @transform_4, window_bounds = array<i64: 16, 8>}, {pipeline_mode = #tpu.pipeline_mode<synchronous>, transform_indices = @transform_5, window_bounds = array<i64: 16, 1>}, {pipeline_mode = #tpu.pipeline_mode<synchronous>, transform_indices = @transform_6, window_bounds = array<i64: 3, 72>}, {pipeline_mode = #tpu.pipeline_mode<synchronous>, transform_indices = @transform_7, window_bounds = array<i64: 3, 1>}, {transform_indices = @transform_8, window_bounds = array<i64: 1, 3, 256>}, {transform_indices = @transform_9, window_bounds = array<i64: 1, 3, 256>}]} {
    %c0 = arith.constant 0 : index
    %c0_0 = arith.constant 0 : index
    %c0_1 = arith.constant 0 : index
    %0 = vector.load %arg1[%c0, %c0_0, %c0_1] : memref<1x8x512xf32, #tpu.memory_space<vmem>>, vector<1x8x512xf32>
    %1 = vector.shape_cast %0 : vector<1x8x512xf32> to vector<8x512xf32>
    %c0_2 = arith.constant 0 : index
    %c0_3 = arith.constant 0 : index
    %2 = vector.load %arg2[%c0_2, %c0_3] : memref<9x512xf32, #tpu.memory_space<vmem>>, vector<9x512xf32>
    %c0_4 = arith.constant 0 : index
    %c0_5 = arith.constant 0 : index
    %3 = vector.load %arg4[%c0_4, %c0_5] : memref<16x1xf32, #tpu.memory_space<vmem>>, vector<16x1xf32>
    %c17_i32 = arith.constant 17 : i32
    %4 = tpu.dynamic_rotate %1 by %c17_i32 dim 1 : vector<8x512xf32>, i32 -> vector<8x512xf32>
    %5 = vector.extract_strided_slice %2 {offsets = [0, 0], sizes = [1, 512], strides = [1, 1]} : vector<9x512xf32> to vector<1x512xf32>
    %6 = vector.broadcast %5 : vector<1x512xf32> to vector<8x512xf32>
    %7 = arith.mulf %4, %6 : vector<8x512xf32>
    %c16_i32 = arith.constant 16 : i32
    %8 = tpu.dynamic_rotate %1 by %c16_i32 dim 1 : vector<8x512xf32>, i32 -> vector<8x512xf32>
    %9 = vector.extract_strided_slice %2 {offsets = [1, 0], sizes = [1, 512], strides = [1, 1]} : vector<9x512xf32> to vector<1x512xf32>
    %10 = vector.broadcast %9 : vector<1x512xf32> to vector<8x512xf32>
    %11 = arith.mulf %8, %10 : vector<8x512xf32>
    %c15_i32 = arith.constant 15 : i32
    %12 = tpu.dynamic_rotate %1 by %c15_i32 dim 1 : vector<8x512xf32>, i32 -> vector<8x512xf32>
    %13 = vector.extract_strided_slice %2 {offsets = [2, 0], sizes = [1, 512], strides = [1, 1]} : vector<9x512xf32> to vector<1x512xf32>
    %14 = vector.broadcast %13 : vector<1x512xf32> to vector<8x512xf32>
    %15 = arith.mulf %12, %14 : vector<8x512xf32>
    %c1_i32 = arith.constant 1 : i32
    %16 = tpu.dynamic_rotate %1 by %c1_i32 dim 1 : vector<8x512xf32>, i32 -> vector<8x512xf32>
    %17 = vector.extract_strided_slice %2 {offsets = [3, 0], sizes = [1, 512], strides = [1, 1]} : vector<9x512xf32> to vector<1x512xf32>
    %18 = vector.broadcast %17 : vector<1x512xf32> to vector<8x512xf32>
    %19 = arith.mulf %16, %18 : vector<8x512xf32>
    %c511_i32 = arith.constant 511 : i32
    %20 = tpu.dynamic_rotate %1 by %c511_i32 dim 1 : vector<8x512xf32>, i32 -> vector<8x512xf32>
    %21 = vector.extract_strided_slice %2 {offsets = [5, 0], sizes = [1, 512], strides = [1, 1]} : vector<9x512xf32> to vector<1x512xf32>
    %22 = vector.broadcast %21 : vector<1x512xf32> to vector<8x512xf32>
    %23 = arith.mulf %20, %22 : vector<8x512xf32>
    %c497_i32 = arith.constant 497 : i32
    %24 = tpu.dynamic_rotate %1 by %c497_i32 dim 1 : vector<8x512xf32>, i32 -> vector<8x512xf32>
    %25 = vector.extract_strided_slice %2 {offsets = [6, 0], sizes = [1, 512], strides = [1, 1]} : vector<9x512xf32> to vector<1x512xf32>
    %26 = vector.broadcast %25 : vector<1x512xf32> to vector<8x512xf32>
    %27 = arith.mulf %24, %26 : vector<8x512xf32>
    %c496_i32 = arith.constant 496 : i32
    %28 = tpu.dynamic_rotate %1 by %c496_i32 dim 1 : vector<8x512xf32>, i32 -> vector<8x512xf32>
    %29 = vector.extract_strided_slice %2 {offsets = [7, 0], sizes = [1, 512], strides = [1, 1]} : vector<9x512xf32> to vector<1x512xf32>
    %30 = vector.broadcast %29 : vector<1x512xf32> to vector<8x512xf32>
    %31 = arith.mulf %28, %30 : vector<8x512xf32>
    %c495_i32 = arith.constant 495 : i32
    %32 = tpu.dynamic_rotate %1 by %c495_i32 dim 1 : vector<8x512xf32>, i32 -> vector<8x512xf32>
    %33 = vector.extract_strided_slice %2 {offsets = [8, 0], sizes = [1, 512], strides = [1, 1]} : vector<9x512xf32> to vector<1x512xf32>
    %34 = vector.broadcast %33 : vector<1x512xf32> to vector<8x512xf32>
    %35 = arith.mulf %32, %34 : vector<8x512xf32>
    %36 = tpu.concatenate %7, %11, %15, %19, %1, %23, %27, %31, %35 in 0 : vector<8x512xf32>, vector<8x512xf32>, vector<8x512xf32>, vector<8x512xf32>, vector<8x512xf32>, vector<8x512xf32>, vector<8x512xf32>, vector<8x512xf32>, vector<8x512xf32> -> vector<72x512xf32>
    %37 = arith.truncf %36 : vector<72x512xf32> to vector<72x512xbf16>
    %c0_6 = arith.constant 0 : index
    %c0_7 = arith.constant 0 : index
    %38 = vector.load %arg3[%c0_6, %c0_7] : memref<16x72xbf16, #tpu.memory_space<vmem>>, vector<16x72xbf16>
    %cst = arith.constant dense<0.000000e+00> : vector<16x512xf32>
    %39 = tpu.matmul %38, %37, %cst {dimension_numbers = #tpu.dot_dimension_numbers<[1], [0], [0], [1], [0, 0, 1, 1], [], []>} : vector<16x72xbf16>, vector<72x512xbf16>, vector<16x512xf32> -> vector<16x512xf32>
    %40 = vector.broadcast %3 : vector<16x1xf32> to vector<16x512xf32>
    %41 = arith.addf %39, %40 : vector<16x512xf32>
    %cst_8 = arith.constant 0.000000e+00 : f32
    %42 = vector.broadcast %cst_8 : f32 to vector<16x512xf32>
    %43 = arith.maximumf %41, %42 : vector<16x512xf32>
    %44 = vector.extract_strided_slice %43 {offsets = [0, 0], sizes = [8, 512], strides = [1, 1]} : vector<16x512xf32> to vector<8x512xf32>
    %45 = vector.extract_strided_slice %43 {offsets = [8, 0], sizes = [8, 512], strides = [1, 1]} : vector<16x512xf32> to vector<8x512xf32>
    %c0_9 = arith.constant 0 : index
    %c0_10 = arith.constant 0 : index
    %46 = vector.load %arg5[%c0_9, %c0_10] : memref<16x8xbf16, #tpu.memory_space<vmem>>, vector<16x8xbf16>
    %47 = arith.truncf %45 : vector<8x512xf32> to vector<8x512xbf16>
    %cst_11 = arith.constant dense<0.000000e+00> : vector<16x512xf32>
    %48 = tpu.matmul %46, %47, %cst_11 {dimension_numbers = #tpu.dot_dimension_numbers<[1], [0], [0], [1], [0, 0, 1, 1], [], []>} : vector<16x8xbf16>, vector<8x512xbf16>, vector<16x512xf32> -> vector<16x512xf32>
    %49 = vector.extract_strided_slice %48 {offsets = [0, 256], sizes = [16, 256], strides = [1, 1]} : vector<16x512xf32> to vector<16x256xf32>
    %cst_12 = arith.constant dense<0.000000e+00> : vector<16xf32>
    %50 = vector.multi_reduction <add>, %49, %cst_12 [1] : vector<16x256xf32> to vector<16xf32>
    %51 = vector.shape_cast %50 : vector<16xf32> to vector<16x1xf32>
    %cst_13 = arith.constant 2.560000e+02 : f32
    %52 = vector.broadcast %cst_13 : f32 to vector<16x1xf32>
    %53 = arith.divf %51, %52 : vector<16x1xf32>
    %c0_14 = arith.constant 0 : index
    %c0_15 = arith.constant 0 : index
    %54 = vector.load %arg6[%c0_14, %c0_15] : memref<16x1xf32, #tpu.memory_space<vmem>>, vector<16x1xf32>
    %55 = arith.addf %53, %54 : vector<16x1xf32>
    %56 = vector.extract_strided_slice %48 {offsets = [0, 0], sizes = [16, 256], strides = [1, 1]} : vector<16x512xf32> to vector<16x256xf32>
    %cst_16 = arith.constant dense<0.000000e+00> : vector<16xf32>
    %57 = vector.multi_reduction <add>, %56, %cst_16 [1] : vector<16x256xf32> to vector<16xf32>
    %58 = vector.shape_cast %57 : vector<16xf32> to vector<16x1xf32>
    %cst_17 = arith.constant 2.560000e+02 : f32
    %59 = vector.broadcast %cst_17 : f32 to vector<16x1xf32>
    %60 = arith.divf %58, %59 : vector<16x1xf32>
    %c0_18 = arith.constant 0 : index
    %c0_19 = arith.constant 0 : index
    %61 = vector.load %arg6[%c0_18, %c0_19] : memref<16x1xf32, #tpu.memory_space<vmem>>, vector<16x1xf32>
    %62 = arith.addf %60, %61 : vector<16x1xf32>
    %63 = vector.extract_strided_slice %44 {offsets = [0, 0], sizes = [8, 256], strides = [1, 1]} : vector<8x512xf32> to vector<8x256xf32>
    %64 = vector.extract_strided_slice %44 {offsets = [0, 256], sizes = [8, 256], strides = [1, 1]} : vector<8x512xf32> to vector<8x256xf32>
    %cst_20 = arith.constant dense<0.000000e+00> : vector<8xf32>
    %65 = vector.multi_reduction <add>, %63, %cst_20 [1] : vector<8x256xf32> to vector<8xf32>
    %66 = vector.shape_cast %65 : vector<8xf32> to vector<8x1xf32>
    %cst_21 = arith.constant 2.560000e+02 : f32
    %67 = vector.broadcast %cst_21 : f32 to vector<8x1xf32>
    %68 = arith.divf %66, %67 : vector<8x1xf32>
    %cst_22 = arith.constant dense<0.000000e+00> : vector<8xf32>
    %69 = vector.multi_reduction <add>, %64, %cst_22 [1] : vector<8x256xf32> to vector<8xf32>
    %70 = vector.shape_cast %69 : vector<8xf32> to vector<8x1xf32>
    %cst_23 = arith.constant 2.560000e+02 : f32
    %71 = vector.broadcast %cst_23 : f32 to vector<8x1xf32>
    %72 = arith.divf %70, %71 : vector<8x1xf32>
    %73 = vector.broadcast %68 : vector<8x1xf32> to vector<8x256xf32>
    %74 = arith.subf %63, %73 : vector<8x256xf32>
    %75 = arith.mulf %74, %74 : vector<8x256xf32>
    %cst_24 = arith.constant dense<0.000000e+00> : vector<8xf32>
    %76 = vector.multi_reduction <add>, %75, %cst_24 [1] : vector<8x256xf32> to vector<8xf32>
    %77 = vector.shape_cast %76 : vector<8xf32> to vector<8x1xf32>
    %cst_25 = arith.constant 2.560000e+02 : f32
    %78 = vector.broadcast %cst_25 : f32 to vector<8x1xf32>
    %79 = arith.divf %77, %78 : vector<8x1xf32>
    %cst_26 = arith.constant 9.99999974E-6 : f32
    %80 = vector.broadcast %cst_26 : f32 to vector<8x1xf32>
    %81 = arith.addf %79, %80 : vector<8x1xf32>
    %82 = math.rsqrt %81 : vector<8x1xf32>
    %83 = vector.broadcast %72 : vector<8x1xf32> to vector<8x256xf32>
    %84 = arith.subf %64, %83 : vector<8x256xf32>
    %85 = arith.mulf %84, %84 : vector<8x256xf32>
    %cst_27 = arith.constant dense<0.000000e+00> : vector<8xf32>
    %86 = vector.multi_reduction <add>, %85, %cst_27 [1] : vector<8x256xf32> to vector<8xf32>
    %87 = vector.shape_cast %86 : vector<8xf32> to vector<8x1xf32>
    %cst_28 = arith.constant 2.560000e+02 : f32
    %88 = vector.broadcast %cst_28 : f32 to vector<8x1xf32>
    %89 = arith.divf %87, %88 : vector<8x1xf32>
    %cst_29 = arith.constant 9.99999974E-6 : f32
    %90 = vector.broadcast %cst_29 : f32 to vector<8x1xf32>
    %91 = arith.addf %89, %90 : vector<8x1xf32>
    %92 = math.rsqrt %91 : vector<8x1xf32>
    %93 = tpu.iota {dimensions = array<i32: 1>} : vector<1x512xi32>
    %c256_i32 = arith.constant 256 : i32
    %94 = vector.broadcast %c256_i32 : i32 to vector<1x512xi32>
    %95 = arith.cmpi sge, %93, %94 : vector<1x512xi32>
    %96 = vector.shape_cast %95 : vector<1x512xi1> to vector<1x512xi1>
    %97 = vector.broadcast %96 : vector<1x512xi1> to vector<8x512xi1>
    %98 = vector.shape_cast %72 : vector<8x1xf32> to vector<8x1xf32>
    %99 = vector.broadcast %98 : vector<8x1xf32> to vector<8x512xf32>
    %100 = vector.shape_cast %68 : vector<8x1xf32> to vector<8x1xf32>
    %101 = vector.broadcast %100 : vector<8x1xf32> to vector<8x512xf32>
    %102 = arith.select %97, %99, %101 : vector<8x512xi1>, vector<8x512xf32>
    %103 = vector.shape_cast %95 : vector<1x512xi1> to vector<1x512xi1>
    %104 = vector.broadcast %103 : vector<1x512xi1> to vector<8x512xi1>
    %105 = vector.shape_cast %92 : vector<8x1xf32> to vector<8x1xf32>
    %106 = vector.broadcast %105 : vector<8x1xf32> to vector<8x512xf32>
    %107 = vector.shape_cast %82 : vector<8x1xf32> to vector<8x1xf32>
    %108 = vector.broadcast %107 : vector<8x1xf32> to vector<8x512xf32>
    %109 = arith.select %104, %106, %108 : vector<8x512xi1>, vector<8x512xf32>
    %110 = vector.extract_strided_slice %62 {offsets = [0, 0], sizes = [8, 1], strides = [1, 1]} : vector<16x1xf32> to vector<8x1xf32>
    %111 = vector.extract_strided_slice %55 {offsets = [0, 0], sizes = [8, 1], strides = [1, 1]} : vector<16x1xf32> to vector<8x1xf32>
    %112 = vector.shape_cast %95 : vector<1x512xi1> to vector<1x512xi1>
    %113 = vector.broadcast %112 : vector<1x512xi1> to vector<8x512xi1>
    %114 = vector.shape_cast %110 : vector<8x1xf32> to vector<8x1xf32>
    %115 = vector.broadcast %114 : vector<8x1xf32> to vector<8x512xf32>
    %116 = vector.shape_cast %111 : vector<8x1xf32> to vector<8x1xf32>
    %117 = vector.broadcast %116 : vector<8x1xf32> to vector<8x512xf32>
    %118 = arith.select %113, %115, %117 : vector<8x512xi1>, vector<8x512xf32>
    %119 = vector.extract_strided_slice %62 {offsets = [8, 0], sizes = [8, 1], strides = [1, 1]} : vector<16x1xf32> to vector<8x1xf32>
    %120 = vector.extract_strided_slice %55 {offsets = [8, 0], sizes = [8, 1], strides = [1, 1]} : vector<16x1xf32> to vector<8x1xf32>
    %121 = vector.shape_cast %95 : vector<1x512xi1> to vector<1x512xi1>
    %122 = vector.broadcast %121 : vector<1x512xi1> to vector<8x512xi1>
    %123 = vector.shape_cast %119 : vector<8x1xf32> to vector<8x1xf32>
    %124 = vector.broadcast %123 : vector<8x1xf32> to vector<8x512xf32>
    %125 = vector.shape_cast %120 : vector<8x1xf32> to vector<8x1xf32>
    %126 = vector.broadcast %125 : vector<8x1xf32> to vector<8x512xf32>
    %127 = arith.select %122, %124, %126 : vector<8x512xi1>, vector<8x512xf32>
    %128 = arith.subf %44, %102 : vector<8x512xf32>
    %129 = arith.mulf %118, %128 : vector<8x512xf32>
    %130 = arith.mulf %129, %109 : vector<8x512xf32>
    %131 = arith.addf %130, %127 : vector<8x512xf32>
    %c0_30 = arith.constant 0 : index
    %c0_31 = arith.constant 0 : index
    %132 = vector.load %arg8[%c0_30, %c0_31] : memref<3x1xf32, #tpu.memory_space<vmem>>, vector<3x1xf32>
    %c17_i32_32 = arith.constant 17 : i32
    %133 = tpu.dynamic_rotate %131 by %c17_i32_32 dim 1 : vector<8x512xf32>, i32 -> vector<8x512xf32>
    %134 = vector.extract_strided_slice %2 {offsets = [0, 0], sizes = [1, 512], strides = [1, 1]} : vector<9x512xf32> to vector<1x512xf32>
    %135 = vector.broadcast %134 : vector<1x512xf32> to vector<8x512xf32>
    %136 = arith.mulf %133, %135 : vector<8x512xf32>
    %c16_i32_33 = arith.constant 16 : i32
    %137 = tpu.dynamic_rotate %131 by %c16_i32_33 dim 1 : vector<8x512xf32>, i32 -> vector<8x512xf32>
    %138 = vector.extract_strided_slice %2 {offsets = [1, 0], sizes = [1, 512], strides = [1, 1]} : vector<9x512xf32> to vector<1x512xf32>
    %139 = vector.broadcast %138 : vector<1x512xf32> to vector<8x512xf32>
    %140 = arith.mulf %137, %139 : vector<8x512xf32>
    %c15_i32_34 = arith.constant 15 : i32
    %141 = tpu.dynamic_rotate %131 by %c15_i32_34 dim 1 : vector<8x512xf32>, i32 -> vector<8x512xf32>
    %142 = vector.extract_strided_slice %2 {offsets = [2, 0], sizes = [1, 512], strides = [1, 1]} : vector<9x512xf32> to vector<1x512xf32>
    %143 = vector.broadcast %142 : vector<1x512xf32> to vector<8x512xf32>
    %144 = arith.mulf %141, %143 : vector<8x512xf32>
    %c1_i32_35 = arith.constant 1 : i32
    %145 = tpu.dynamic_rotate %131 by %c1_i32_35 dim 1 : vector<8x512xf32>, i32 -> vector<8x512xf32>
    %146 = vector.extract_strided_slice %2 {offsets = [3, 0], sizes = [1, 512], strides = [1, 1]} : vector<9x512xf32> to vector<1x512xf32>
    %147 = vector.broadcast %146 : vector<1x512xf32> to vector<8x512xf32>
    %148 = arith.mulf %145, %147 : vector<8x512xf32>
    %c511_i32_36 = arith.constant 511 : i32
    %149 = tpu.dynamic_rotate %131 by %c511_i32_36 dim 1 : vector<8x512xf32>, i32 -> vector<8x512xf32>
    %150 = vector.extract_strided_slice %2 {offsets = [5, 0], sizes = [1, 512], strides = [1, 1]} : vector<9x512xf32> to vector<1x512xf32>
    %151 = vector.broadcast %150 : vector<1x512xf32> to vector<8x512xf32>
    %152 = arith.mulf %149, %151 : vector<8x512xf32>
    %c497_i32_37 = arith.constant 497 : i32
    %153 = tpu.dynamic_rotate %131 by %c497_i32_37 dim 1 : vector<8x512xf32>, i32 -> vector<8x512xf32>
    %154 = vector.extract_strided_slice %2 {offsets = [6, 0], sizes = [1, 512], strides = [1, 1]} : vector<9x512xf32> to vector<1x512xf32>
    %155 = vector.broadcast %154 : vector<1x512xf32> to vector<8x512xf32>
    %156 = arith.mulf %153, %155 : vector<8x512xf32>
    %c496_i32_38 = arith.constant 496 : i32
    %157 = tpu.dynamic_rotate %131 by %c496_i32_38 dim 1 : vector<8x512xf32>, i32 -> vector<8x512xf32>
    %158 = vector.extract_strided_slice %2 {offsets = [7, 0], sizes = [1, 512], strides = [1, 1]} : vector<9x512xf32> to vector<1x512xf32>
    %159 = vector.broadcast %158 : vector<1x512xf32> to vector<8x512xf32>
    %160 = arith.mulf %157, %159 : vector<8x512xf32>
    %c495_i32_39 = arith.constant 495 : i32
    %161 = tpu.dynamic_rotate %131 by %c495_i32_39 dim 1 : vector<8x512xf32>, i32 -> vector<8x512xf32>
    %162 = vector.extract_strided_slice %2 {offsets = [8, 0], sizes = [1, 512], strides = [1, 1]} : vector<9x512xf32> to vector<1x512xf32>
    %163 = vector.broadcast %162 : vector<1x512xf32> to vector<8x512xf32>
    %164 = arith.mulf %161, %163 : vector<8x512xf32>
    %165 = tpu.concatenate %136, %140, %144, %148, %131, %152, %156, %160, %164 in 0 : vector<8x512xf32>, vector<8x512xf32>, vector<8x512xf32>, vector<8x512xf32>, vector<8x512xf32>, vector<8x512xf32>, vector<8x512xf32>, vector<8x512xf32>, vector<8x512xf32> -> vector<72x512xf32>
    %166 = arith.truncf %165 : vector<72x512xf32> to vector<72x512xbf16>
    %c0_40 = arith.constant 0 : index
    %c0_41 = arith.constant 0 : index
    %167 = vector.load %arg7[%c0_40, %c0_41] : memref<3x72xbf16, #tpu.memory_space<vmem>>, vector<3x72xbf16>
    %cst_42 = arith.constant dense<0.000000e+00> : vector<3x512xf32>
    %168 = tpu.matmul %167, %166, %cst_42 {dimension_numbers = #tpu.dot_dimension_numbers<[1], [0], [0], [1], [0, 0, 1, 1], [], []>} : vector<3x72xbf16>, vector<72x512xbf16>, vector<3x512xf32> -> vector<3x512xf32>
    %169 = vector.broadcast %132 : vector<3x1xf32> to vector<3x512xf32>
    %170 = arith.addf %168, %169 : vector<3x512xf32>
    %171 = math.tanh %170 : vector<3x512xf32>
    %172 = vector.extract_strided_slice %171 {offsets = [0, 0], sizes = [3, 256], strides = [1, 1]} : vector<3x512xf32> to vector<3x256xf32>
    %c0_43 = arith.constant 0 : index
    %c0_44 = arith.constant 0 : index
    %c0_45 = arith.constant 0 : index
    %173 = vector.load %arg9[%c0_43, %c0_44, %c0_45] : memref<1x3x256xf32, #tpu.memory_space<vmem>>, vector<1x3x256xf32>
    %174 = vector.shape_cast %173 : vector<1x3x256xf32> to vector<3x256xf32>
    %175 = vector.shape_cast %172 : vector<3x256xf32> to vector<1x3x256xf32>
    tpu.vector_store %arg9[%c0_43, %c0_44, %c0_45], %175 {strides = array<i32>} : memref<1x3x256xf32, #tpu.memory_space<vmem>>, vector<1x3x256xf32>,
    %176 = vector.extract_strided_slice %171 {offsets = [0, 256], sizes = [3, 256], strides = [1, 1]} : vector<3x512xf32> to vector<3x256xf32>
    %c0_46 = arith.constant 0 : index
    %c0_47 = arith.constant 0 : index
    %c0_48 = arith.constant 0 : index
    %177 = vector.load %arg10[%c0_46, %c0_47, %c0_48] : memref<1x3x256xf32, #tpu.memory_space<vmem>>, vector<1x3x256xf32>
    %178 = vector.shape_cast %177 : vector<1x3x256xf32> to vector<3x256xf32>
    %179 = vector.shape_cast %176 : vector<3x256xf32> to vector<1x3x256xf32>
    tpu.vector_store %arg10[%c0_46, %c0_47, %c0_48], %179 {strides = array<i32>} : memref<1x3x256xf32, #tpu.memory_space<vmem>>, vector<1x3x256xf32>,
    return
  }
  func.func @transform_0(%arg0: i32) -> (i32, i32, i32) {
    %c0_i32 = arith.constant 0 : i32
    %c0_i32_0 = arith.constant 0 : i32
    %c0_i32_1 = arith.constant 0 : i32
    return %arg0, %c0_i32, %c0_i32_0 : i32, i32, i32
  }
  func.func @transform_1(%arg0: i32) -> (i32, i32) {
    %c0_i32 = arith.constant 0 : i32
    %c0_i32_0 = arith.constant 0 : i32
    %c0_i32_1 = arith.constant 0 : i32
    return %c0_i32, %c0_i32_0 : i32, i32
  }
  func.func @transform_2(%arg0: i32) -> (i32, i32) {
    %c0_i32 = arith.constant 0 : i32
    %c0_i32_0 = arith.constant 0 : i32
    %c0_i32_1 = arith.constant 0 : i32
    return %c0_i32, %c0_i32_0 : i32, i32
  }
  func.func @transform_3(%arg0: i32) -> (i32, i32) {
    %c0_i32 = arith.constant 0 : i32
    %c0_i32_0 = arith.constant 0 : i32
    %c0_i32_1 = arith.constant 0 : i32
    return %c0_i32, %c0_i32_0 : i32, i32
  }
  func.func @transform_4(%arg0: i32) -> (i32, i32) {
    %c0_i32 = arith.constant 0 : i32
    %c0_i32_0 = arith.constant 0 : i32
    %c0_i32_1 = arith.constant 0 : i32
    return %c0_i32, %c0_i32_0 : i32, i32
  }
  func.func @transform_5(%arg0: i32) -> (i32, i32) {
    %c0_i32 = arith.constant 0 : i32
    %c0_i32_0 = arith.constant 0 : i32
    %c0_i32_1 = arith.constant 0 : i32
    return %c0_i32, %c0_i32_0 : i32, i32
  }
  func.func @transform_6(%arg0: i32) -> (i32, i32) {
    %c0_i32 = arith.constant 0 : i32
    %c0_i32_0 = arith.constant 0 : i32
    %c0_i32_1 = arith.constant 0 : i32
    return %c0_i32, %c0_i32_0 : i32, i32
  }
  func.func @transform_7(%arg0: i32) -> (i32, i32) {
    %c0_i32 = arith.constant 0 : i32
    %c0_i32_0 = arith.constant 0 : i32
    %c0_i32_1 = arith.constant 0 : i32
    return %c0_i32, %c0_i32_0 : i32, i32
  }
  func.func @transform_8(%arg0: i32) -> (i32, i32, i32) {
    %c0_i32 = arith.constant 0 : i32
    %c0_i32_0 = arith.constant 0 : i32
    %c0_i32_1 = arith.constant 0 : i32
    return %arg0, %c0_i32, %c0_i32_0 : i32, i32, i32
  }
  func.func @transform_9(%arg0: i32) -> (i32, i32, i32) {
    %c0_i32 = arith.constant 0 : i32
    %c0_i32_0 = arith.constant 0 : i32
    %c0_i32_1 = arith.constant 0 : i32
    return %arg0, %c0_i32, %c0_i32_0 : i32, i32, i32
  }
}

</mosaic_0001>

<bundles_post_ra>
// kernel: trainer_forward.1
= control target key start
LH: loop header
LB: loop body
LE: loop exit
PB: predicated region body
PF: predicated region fallthrough
CT: control target
= control target key end

     0   :  { %s1345_s30 = smov 0   ;;  %s2029_s0 = inlined_call_operand.vmem [shape: f32[2,8,512], index: 0, kind: input, shape index: {}]   ;;  %s2030_s1 = inlined_call_operand.vmem [shape: f32[9,512], index: 1, kind: input, shape index: {}]   ;;  %s2031_s2 = inlined_call_operand.vmem [shape: bf16[16,72], index: 2, kind: input, shape index: {}]   ;;  %s2032_s3 = inlined_call_operand.vmem [shape: f32[16,1], index: 3, kind: input, shape index: {}]   ;;  %s2033_s4 = inlined_call_operand.vmem [shape: bf16[16,8], index: 4, kind: input, shape index: {}]   ;;  %s2034_s5 = inlined_call_operand.vmem [shape: f32[16,1], index: 5, kind: input, shape index: {}]   ;;  %s2035_s6 = inlined_call_operand.vmem [shape: bf16[3,72], index: 6, kind: input, shape index: {}]   ;;  %s2036_s7 = inlined_call_operand.vmem [shape: f32[3,1], index: 7, kind: input, shape index: {}]   ;;  %s2037_s8 = inlined_call_operand.vmem [shape: f32[2,3,256], index: 8, kind: output, shape index: {0}]   ;;  %s2038_s9 = inlined_call_operand.vmem [shape: f32[2,3,256], index: 9, kind: output, shape index: {1}]  }
   0x1 LB: > { %s1200_s10 = sadd.s32 4294967295, %s1283_s30   ;;  %p1204_p0 = scmp.ge.s32.totalorder %s1283_s30, 1  ;;  %s1283_s30 = sphi %s1345_s30, %s20_s30  }
   0x2   : > { %p290_p1 = scmp.lt.s32.totalorder %s1283_s30, 3 }
   0x4   : > { %p291_p2 = pnand %p1204_p0, %p290_p1 }
   0x5   : > { %p331_p3 = scmp.lt.s32.totalorder (!%p291_p2), %s1200_s10, 1  ;;  %s1285_s15 = smov (!%p291_p2), 111  }
   0x6   : > { %294 = sbr.rel (%p291_p2) target bundleno = 1074 (0x432), region = 52  ;;  %s1286_s16 = smov (!%p291_p2), 113  }
   0x7   : > { %s1287_s17 = smov (!%p291_p2), 112   ;;  %s1288_s18 = smov (!%p291_p2), 127  }
   0x8   : > { %s1289_s19 = smov (!%p291_p2), 15   ;;  %s1290_s20 = smov (!%p291_p2), 1  }
   0x9   : > { %s1291_s21 = smov (!%p291_p2), 17   ;;  %s1292_s22 = smov (!%p291_p2), 16  }
   0xb   : > { %s2044_s10 = smov (!%p331_p3, %s1200_s10), 1  ;;  %v369_v6 = vlaneseq  ;;  %v1439_v9 = vld [vmem:[%s2030_s1 + $0x38] ss:$0 sm:$0xff]  ;;  %vm572_vm1 = vcmask 1043456   ;;  %v1448_v16 = vld [vmem:[%s2030_s1 + $0x30] ss:$0 sm:$0xff] }
   0xc   : > { %s1233_s11 = sshll.u32 %s2044_s10, 5  ;;  %v1457_v21 = vld [vmem:[%s2030_s1 + $0x10] sm:$0xff]  ;;  %v1464_v23 = vld [vmem:[%s2030_s1 + $0x18] sm:$0xff]  ;;  %v1518_v54 = vld [vmem:[%s2030_s1 + $0x20] ss:$0 sm:$0xff]  ;;  %vm568_vm9 = vcmask 588800  }
   0xd   : > { %s335_s14 = scalar_lea.vmem %s2029_s0, %s1233_s11  ;;  %v1433_v7 = vand.u32 127, %v369_v6  ;;  %v483_v25 = vperm.slane %v1457_v21, 6  ;;  %v504_v26 = vperm.slane %v1457_v21, 7  ;;  %v484_v28 = vperm.slane %v1464_v23, 6  ;;  %v1523_v55 = vld [vmem:[%s2030_s1 + $0x28] ss:$0 sm:$0xff] }
   0xe   : > { %v1359_v0 = vld [vmem:[%s335_s14 + $0x18] sm:$0xff]  ;;  %v1361_v1 = vld [vmem:[%s335_s14 + $0x10] sm:$0xff]  ;;  %v1363_v2 = vld [vmem:[%s335_s14] sm:$0xff]  ;;  %v505_v30 = vperm.slane %v1464_v23, 7  ;;  %v462_v43 = vperm.slane %v1457_v21, 5  ;;  %v463_v44 = vperm.slane %v1464_v23, 5 }
   0xf   : > { %516 = vrot.lane.b32.xlu1 %v1359_v0, %s1285_s15  ;;  %472 = vrot.lane.b32.xlu2 %v1361_v1, %s1286_s16  ;;  %v1389_v3 = vld [vmem:[%s335_s14 + $0x8] sm:$0xff]  ;;  %vm518_vm0 = vcmp.lt.s32.totalorder %v1433_v7, 111  ;;  %vm476_vm2 = vcmp.lt.s32.totalorder %v1433_v7, 113  ;;  %vm497_vm3 = vcmp.lt.s32.totalorder %v1433_v7, 112  ;;  %vm455_vm4 = vcmp.lt.s32.totalorder %v1433_v7, 127 }
  0x10   : > { %510 = vrot.lane.b32.xlu0 %v1363_v2, %s1285_s15  ;;  %vm413_vm5 = vcmp.lt.s32.totalorder %v1433_v7, 15  ;;  %vm434_vm6 = vcmp.lt.s32.totalorder %v1433_v7, 1  ;;  %vm371_vm7 = vcmp.lt.s32.totalorder %v1433_v7, 17  ;;  %vm392_vm8 = vcmp.lt.s32.totalorder %v1433_v7, 16 }
  0x11   : > { %vm660_vm10 = vcmask 64512  }
  0x17   : > { %474 = vrot.lane.b32.xlu2 %v1359_v0, %s1286_s16  ;;  %468 = vrot.lane.b32.xlu1 %v1363_v2, %s1286_s16 }
  0x18   : > { %514 = vrot.lane.b32.xlu0 %v1361_v1, %s1285_s15 }
  0x1f   : > { %495 = vrot.lane.b32.xlu2 %v1359_v0, %s1287_s17  ;;  %493 = vrot.lane.b32.xlu1 %v1361_v1, %s1287_s17 }
  0x20   : > { %489 = vrot.lane.b32.xlu0 %v1363_v2, %s1287_s17 }
  0x27   : > { %453 = vrot.lane.b32.xlu2 %v1359_v0, %s1288_s18  ;;  %451 = vrot.lane.b32.xlu1 %v1361_v1, %s1288_s18 }
  0x28   : > { %447 = vrot.lane.b32.xlu0 %v1363_v2, %s1288_s18 }
  0x2f   : > { %409 = vrot.lane.b32.xlu2 %v1361_v1, %s1289_s19  ;;  %407 = vrot.lane.b32.xlu1 %v1389_v3, %s1289_s19 }
  0x30   : > { %512 = vrot.lane.b32.xlu0 %v1389_v3, %s1285_s15 }
  0x37   : > { %430 = vrot.lane.b32.xlu2 %v1361_v1, %s1290_s20  ;;  %428 = vrot.lane.b32.xlu1 %v1389_v3, %s1290_s20 }
  0x38   : > { %411 = vrot.lane.b32.xlu0 %v1359_v0, %s1289_s19 }
  0x3f   : > { %365 = vrot.lane.b32.xlu2 %v1361_v1, %s1291_s21  ;;  %363 = vrot.lane.b32.xlu1 %v1389_v3, %s1291_s21 }
  0x40   : > { %432 = vrot.lane.b32.xlu0 %v1359_v0, %s1290_s20 }
  0x47   : > { %388 = vrot.lane.b32.xlu2 %v1361_v1, %s1292_s22  ;;  %386 = vrot.lane.b32.xlu1 %v1389_v3, %s1292_s22 }
  0x48   : > { %367 = vrot.lane.b32.xlu0 %v1359_v0, %s1291_s21 }
  0x4f   : > { %491 = vrot.lane.b32.xlu2 %v1389_v3, %s1287_s17  ;;  %470 = vrot.lane.b32.xlu1 %v1389_v3, %s1286_s16 }
  0x50   : > { %390 = vrot.lane.b32.xlu0 %v1359_v0, %s1292_s22 }
  0x57   : > { %426 = vrot.lane.b32.xlu2 %v1363_v2, %s1290_s20  ;;  %405 = vrot.lane.b32.xlu1 %v1363_v2, %s1289_s19 }
  0x58   : > { %449 = vrot.lane.b32.xlu0 %v1389_v3, %s1288_s18 }
  0x5f   : > { %384 = vrot.lane.b32.xlu1 %v1363_v2, %s1292_s22 }
  0x60   : > { %361 = vrot.lane.b32.xlu0 %v1363_v2, %s1291_s21 }
  0x69   : > { %v1431_v4 = vpop.permute.xlu2 %472 }
  0x71   : > { %v475_v5 = vpop.permute.xlu2 %474 }
  0x72   : > { %v477_v27 = vsel %vm476_vm2, %v1431_v4, %v475_v5 }
  0x73   : > { %v487_v35 = vmul.f32 %v483_v25, %v477_v27 }
  0x79   : > { %v496_v8 = vpop.permute.xlu2 %495 }
  0x81   : > { %v517_v10 = vpop.permute.xlu1 %516  ;;  %v454_v18 = vpop.permute.xlu2 %453 }
  0x82   : > { %v511_v11 = vpop.permute.xlu0 %510 }
  0x83   : > { %v522_v12 = vsel %vm518_vm0, %v517_v10, %v511_v11 }
  0x84   : > { %v530_v13 = vmul.f32 %v1439_v9, %v522_v12 }
  0x86   : > { %v550_v14 = vpack.c.bf16 %v530_v13, %v530_v13 }
  0x88   : > { %v583_v15 = vsel %vm572_vm1, %v550_v14, 0 }
  0x89   : > { %630 = vmatpush.bf16.msra.mxu3 %v583_v15  ;;  %v1450_v17 = vpop.permute.xlu1 %468  ;;  %v410_v38 = vpop.permute.xlu2 %409 }
  0x8a   : > { %v515_v19 = vpop.permute.xlu0 %514  ;;  %v480_v31 = vsel %vm476_vm2, %v475_v5, %v1450_v17 }
  0x8b   : > { %v519_v20 = vsel %vm518_vm0, %v515_v19, %v517_v10  ;;  %v488_v39 = vmul.f32 %v484_v28, %v480_v31 }
  0x8c   : > { %v529_v22 = vmul.f32 %v1448_v16, %v519_v20  ;;  %v442_v20 = vperm.slane %v1464_v23, 3 }
  0x8e   : > { %v549_v24 = vpack.c.bf16 %v529_v22, %v529_v22 }
  0x90   : > { %v580_v29 = vsel %vm572_vm1, %v549_v24, 0 }
  0x91   : > { %616 = vmatpush.bf16.msra.mxu2 %v580_v29  ;;  %v1478_v32 = vpop.permute.xlu1 %493  ;;  %v431_v52 = vpop.permute.xlu2 %430 }
  0x92   : > { %v498_v33 = vsel %vm497_vm3, %v1478_v32, %v496_v8  ;;  %v1483_v34 = vpop.permute.xlu0 %489 }
  0x93   : > { %v508_v36 = vmul.f32 %v504_v26, %v498_v33  ;;  %v501_v37 = vsel %vm497_vm3, %v496_v8, %v1483_v34 }
  0x94   : > { %v509_v40 = vmul.f32 %v505_v30, %v501_v37  ;;  %v378_v37 = vperm.slane %v1457_v21, 0 }
  0x95   : > { %v545_v41 = vpack.c.bf16 %v508_v36, %v487_v35 }
  0x96   : > { %v546_v42 = vpack.c.bf16 %v509_v40, %v488_v39 }
  0x97   : > { %617 = vmatpush.bf16.msra.mxu2 %v545_v41  ;;  %v1293_v41 = vmov 0  }
  0x98   : > { %631 = vmatpush.bf16.msra.mxu3 %v546_v42  ;;  %1257 = vset.pattern.permute.xlu0 %v1293_v41  ;;  %v1581_v42 = vld [vmem:[%s2030_s1] sm:$0xff] }
  0x99   : > { %v1499_v45 = vpop.permute.xlu1 %451  ;;  %v366_v5 = vpop.permute.xlu2 %365  ;;  %1256 = vset.pattern.permute.xlu2 %v1293_v41  ;;  %1258 = vset.pattern.permute.xlu1 %v1293_v41 }
  0x9a   : > { %v456_v46 = vsel %vm455_vm4, %v1499_v45, %v454_v18  ;;  %v1504_v47 = vpop.permute.xlu0 %447 }
  0x9b   : > { %v466_v48 = vmul.f32 %v462_v43, %v456_v46  ;;  %v459_v49 = vsel %vm455_vm4, %v454_v18, %v1504_v47 }
  0x9c   : > { %v467_v50 = vmul.f32 %v463_v44, %v459_v49  ;;  %v1591_v49 = vld [vmem:[%s2030_s1 + $0x8] sm:$0xff] }
  0x9d   : > { %v541_v51 = vpack.c.bf16 %v466_v48, %v1361_v1  ;;  %v441_v1 = vperm.slane %v1457_v21, 3 }
  0x9e   : > { %v542_v53 = vpack.c.bf16 %v467_v50, %v1359_v0  ;;  %v420_v0 = vperm.slane %v1457_v21, 2 }
  0x9f   : > { %618 = vmatpush.bf16.msra.mxu2 %v541_v51 }
  0xa0   : > { %632 = vmatpush.bf16.msra.mxu3 %v542_v53  ;;  %v360_v53 = vld [vmem:[%s2032_s3 + $0x8] sm:$0xff] }
  0xa1   : > { %v1525_v56 = vpop.permute.xlu1 %407  ;;  %v389_v27 = vpop.permute.xlu2 %388  ;;  %560 = vperm.xlu2 %1256, %v360_v53   ;;  %v419_v53 = vperm.slane %v1591_v49, 2 }
  0xa2   : > { %v513_v57 = vpop.permute.xlu0 %512  ;;  %v415_v6 = vsel %vm413_vm5, %v1525_v56, %v410_v38 }
  0xa3   : > { %v520_v58 = vsel %vm518_vm0, %v513_v57, %v515_v19  ;;  %v521_v59 = vsel %vm518_vm0, %v511_v11, %v513_v57  ;;  %v424_v14 = vmul.f32 %v420_v0, %v415_v6  ;;  %v421_v19 = vperm.slane %v1464_v23, 2 }
  0xa4   : > { %v527_v60 = vmul.f32 %v1518_v54, %v521_v59  ;;  %v528_v61 = vmul.f32 %v1523_v55, %v520_v58  ;;  %v502_v59 = vperm.slane %v1581_v42, 7  ;;  %v482_v6 = vperm.slane %v1591_v49, 6 }
  0xa6   : > { %v547_v62 = vpack.c.bf16 %v527_v60, %v527_v60  ;;  %v548_v63 = vpack.c.bf16 %v528_v61, %v528_v61  ;;  %v503_v60 = vperm.slane %v1591_v49, 7  ;;  %v1608_v61 = vld [vmem:[%s2031_s2] sm:$0xff] }
  0xa8   : > { %v574_v8 = vsel %vm572_vm1, %v547_v62, 0  ;;  %v577_v10 = vsel %vm572_vm1, %v548_v63, 0  ;;  %v481_v63 = vperm.slane %v1581_v42, 6 }
  0xa9   : > { %588 = vmatpush.bf16.msra.mxu0 %v574_v8  ;;  %602 = vmatpush.bf16.msra.mxu1 %v577_v10  ;;  %v1542_v11 = vpop.permute.xlu1 %428  ;;  %v492_v57 = vpop.permute.xlu2 %491  ;;  %v379_v10 = vperm.slane %v1464_v23, 0 }
  0xaa   : > { %v436_v12 = vsel %vm434_vm6, %v1542_v11, %v431_v52  ;;  %v1547_v13 = vpop.permute.xlu0 %411  ;;  %v500_v62 = vsel %vm497_vm3, %v1483_v34, %v492_v57  ;;  %v499_v8 = vsel %vm497_vm3, %v492_v57, %v1478_v32 }
  0xab   : > { %v445_v15 = vmul.f32 %v441_v1, %v436_v12  ;;  %v414_v22 = vsel %vm413_vm5, %v410_v38, %v1547_v13  ;;  %v399_v38 = vperm.slane %v1457_v21, 1  ;;  %v400_v12 = vperm.slane %v1464_v23, 1 }
  0xac   : > { %v425_v33 = vmul.f32 %v421_v19, %v414_v22  ;;  %v506_v34 = vmul.f32 %v502_v59, %v500_v62 }
  0xad   : > { %v537_v18 = vpack.c.bf16 %v445_v15, %v424_v14 }
  0xaf   : > { %619 = vmatpush.bf16.msra.mxu2 %v537_v18 }
  0xb1   : > { %v1558_v24 = vpop.permute.xlu1 %363 }
  0xb2   : > { %v1560_v29 = vpop.permute.xlu0 %432  ;;  %v373_v39 = vsel %vm371_vm7, %v1558_v24, %v366_v5 }
  0xb3   : > { %v435_v31 = vsel %vm434_vm6, %v431_v52, %v1560_v29  ;;  %v382_v50 = vmul.f32 %v378_v37, %v373_v39  ;;  %v359_v52 = vld [vmem:[%s2032_s3] sm:$0xff] }
  0xb4   : > { %v446_v35 = vmul.f32 %v442_v20, %v435_v31  ;;  %555 = vperm.xlu0 %1257, %v359_v52   ;;  %v507_v31 = vmul.f32 %v503_v60, %v499_v8  ;;  %v427_v52 = vpop.permute.xlu2 %426 }
  0xb6   : > { %v538_v36 = vpack.c.bf16 %v446_v35, %v425_v33 }
  0xb8   : > { %633 = vmatpush.bf16.msra.mxu3 %v538_v36 }
  0xb9   : > { %v1576_v40 = vpop.permute.xlu1 %386 }
  0xba   : > { %v394_v46 = vsel %vm392_vm8, %v1576_v40, %v389_v27  ;;  %v1586_v48 = vpop.permute.xlu0 %367 }
  0xbb   : > { %v403_v51 = vmul.f32 %v399_v38, %v394_v46  ;;  %v372_v14 = vsel %vm371_vm7, %v366_v5, %v1586_v48  ;;  %v460_v46 = vperm.slane %v1581_v42, 5 }
  0xbc   : > { %v383_v35 = vmul.f32 %v379_v10, %v372_v14 }
  0xbd   : > { %v533_v58 = vpack.c.bf16 %v403_v51, %v382_v50  ;;  %v461_v50 = vperm.slane %v1591_v49, 5 }
  0xbf   : > { %620 = vmatpush.bf16.msra.mxu2 %v533_v58 }
  0xc1   : > { %v471_v15 = vpop.permute.xlu1 %470 }
  0xc2   : > { %v478_v18 = vsel %vm476_vm2, %v471_v15, %v1431_v4  ;;  %v479_v32 = vsel %vm476_vm2, %v1450_v17, %v471_v15  ;;  %v391_v22 = vpop.permute.xlu0 %390  ;;  %1217 = vmatmul.msk.bf16.vlgmr.msra.gmra.mxu2 %vm568_vm9, %v1608_v61  ;;  %v440_v15 = vperm.slane %v1591_v49, 3 }
  0xc3   : > { %v485_v5 = vmul.f32 %v481_v63, %v479_v32  ;;  %v486_v33 = vmul.f32 %v482_v6, %v478_v18  ;;  %v393_v4 = vsel %vm392_vm8, %v389_v27, %v391_v22  ;;  %v418_v27 = vperm.slane %v1581_v42, 2 }
  0xc4   : > { %v404_v17 = vmul.f32 %v400_v12, %v393_v4  ;;  %v2039_v4 = vperm.slane %v1591_v49, 1 }
  0xc5   : > { %v543_v36 = vpack.c.bf16 %v506_v34, %v485_v5  ;;  %v544_v39 = vpack.c.bf16 %v507_v31, %v486_v33  ;;  %v439_v34 = vperm.slane %v1581_v42, 3  ;;  %v2040_v33 = vperm.slane %v1581_v42, 1 }
  0xc6   : > { %v534_v41 = vpack.c.bf16 %v404_v17, %v383_v35  ;;  %v376_v35 = vperm.slane %v1581_v42, 0  ;;  %v377_v17 = vperm.slane %v1591_v49, 0 }
  0xc7   : > { %589 = vmatpush.bf16.msra.mxu0 %v543_v36  ;;  %603 = vmatpush.bf16.msra.mxu1 %v544_v39 }
  0xc8   : > { %634 = vmatpush.bf16.msra.mxu3 %v534_v41 }
  0xc9   : > { %v406_v51 = vpop.permute.xlu1 %405 }
  0xca   : > { %v450_v57 = vpop.permute.xlu0 %449  ;;  %v416_v58 = vsel %vm413_vm5, %v406_v51, %v1525_v56  ;;  %v417_v62 = vsel %vm413_vm5, %v1547_v13, %v406_v51 }
  0xcb   : > { %v457_v8 = vsel %vm455_vm4, %v450_v57, %v1499_v45  ;;  %v458_v14 = vsel %vm455_vm4, %v1504_v47, %v450_v57  ;;  %1218 = vmatmul.msk.bf16.vlgmr.msra.gmra.mxu3 %vm568_vm9, %v1608_v61  ;;  %v437_v45 = vsel %vm434_vm6, %v427_v52, %v1542_v11  ;;  %v438_v47 = vsel %vm434_vm6, %v1560_v29, %v427_v52 }
  0xcc   : > { %v464_v56 = vmul.f32 %v460_v46, %v458_v14  ;;  %v465_v13 = vmul.f32 %v461_v50, %v457_v8  ;;  %v422_v18 = vmul.f32 %v418_v27, %v417_v62  ;;  %v423_v32 = vmul.f32 %v419_v53, %v416_v58 }
  0xcd   : > { %v444_v11 = vmul.f32 %v440_v15, %v437_v45  ;;  %v443_v29 = vmul.f32 %v439_v34, %v438_v47 }
  0xce   : > { %v539_v31 = vpack.c.bf16 %v464_v56, %v1363_v2  ;;  %v540_v5 = vpack.c.bf16 %v465_v13, %v1389_v3 }
  0xcf   : > { %v535_v41 = vpack.c.bf16 %v443_v29, %v422_v18  ;;  %v536_v51 = vpack.c.bf16 %v444_v11, %v423_v32 }
  0xd0   : > { %590 = vmatpush.bf16.msra.mxu0 %v539_v31  ;;  %604 = vmatpush.bf16.msra.mxu1 %v540_v5 }
  0xd1   : > { %v385_v36 = vpop.permute.xlu1 %384 }
  0xd2   : > { %v395_v2 = vsel %vm392_vm8, %v385_v36, %v1576_v40  ;;  %v396_v3 = vsel %vm392_vm8, %v391_v22, %v385_v36  ;;  %v362_v39 = vpop.permute.xlu0 %361 }
  0xd3   : > { %v401_v52 = vmul.f32 %v2040_v33, %v396_v3  ;;  %v402_v57 = vmul.f32 %v2039_v4, %v395_v2  ;;  %v374_v58 = vsel %vm371_vm7, %v362_v39, %v1558_v24  ;;  %v375_v40 = vsel %vm371_vm7, %v1586_v48, %v362_v39  ;;  %v1237_v3 = vld [vmem:[%s2033_s4] sm:$0xff] }
  0xd4   : > { %v380_v22 = vmul.f32 %v376_v35, %v375_v40  ;;  %v381_v62 = vmul.f32 %v377_v17, %v374_v58  ;;  %591 = vmatpush.bf16.msra.mxu0 %v535_v41  ;;  %605 = vmatpush.bf16.msra.mxu1 %v536_v51 }
  0xd6   : > { %v531_v8 = vpack.c.bf16 %v401_v52, %v380_v22  ;;  %v532_v14 = vpack.c.bf16 %v402_v57, %v381_v62 }
  0xd8   : > { %592 = vmatpush.bf16.msra.mxu0 %v531_v8  ;;  %606 = vmatpush.bf16.msra.mxu1 %v532_v14 }
  0xdb   : > { %1215 = vmatmul.msk.bf16.vlgmr.msra.gmra.mxu0 %vm568_vm9, %v1608_v61  ;;  %1216 = vmatmul.msk.bf16.vlgmr.msra.gmra.mxu1 %vm568_vm9, %v1608_v61 }
  0xfb   : > { %v561_v13 = vpop.permute.xlu2 %560 }
 0x126   : > { %v556_v48 = vpop.permute.xlu0 %555 }
 0x145   : > { %v622_v24 = vpop.f32.mrf.mxu2 }
 0x146   : > { %v623_v56 = vadd.f32 %v622_v24, %v556_v48 }
 0x148   : > { %v643_v31 = vmax.f32 %v623_v56, 0.0 }
 0x14d   : > { %v624_v45 = vpop.f32.mrf.mxu2 }
 0x14e   : > { %v636_v47 = vpop.f32.mrf.mxu3  ;;  %v625_v18 = vadd.f32 %v624_v45, %v561_v13 }
 0x14f   : > { %v637_v32 = vadd.f32 %v636_v47, %v556_v48 }
 0x150   : > { %v647_v5 = vmax.f32 %v625_v18, 0.0 }
 0x151   : > { %v644_v11 = vmax.f32 %v637_v32, 0.0 }
 0x152   : > { %v653_v29 = vpack.c.bf16 %v647_v5, %v647_v5 }
 0x153   : > { %v765_v36 = vadd.f32 %v644_v11, %v643_v31 }
 0x154   : > { %v671_v2 = vsel %vm572_vm1, %v653_v29, 0 }
 0x155   : > { %766 = vadd.xlane.f32.xlu2 %v765_v36  ;;  %711 = vmatpush.bf16.msrb.mxu2 %v671_v2  ;;  %v1294_v2 = vmov 256.0  }
 0x156   : > { %v638_v61 = vpop.f32.mrf.mxu3  ;;  %1263 = vrcp.f32 %v1294_v2 }
 0x157   : > { %v639_v39 = vadd.f32 %v638_v61, %v561_v13 }
 0x158   : > { %v594_v41 = vpop.f32.mrf.mxu0  ;;  %v608_v51 = vpop.f32.mrf.mxu1  ;;  %1225 = vmatmul.msk.bf16.vlgmr.msrb.gmra.mxu2 %vm660_vm10, %v1237_v3 }
 0x159   : > { %v648_v52 = vmax.f32 %v639_v39, 0.0  ;;  %v595_v57 = vadd.f32 %v594_v41, %v556_v48  ;;  %v609_v58 = vadd.f32 %v608_v51, %v556_v48 }
 0x15b   : > { %v654_v40 = vpack.c.bf16 %v648_v52, %v648_v52  ;;  %v641_v22 = vmax.f32 %v595_v57, 0.0  ;;  %v642_v62 = vmax.f32 %v609_v58, 0.0 }
 0x15c   : > { %v1264_v61 = vpop.eup %1263 }
 0x15d   : > { %v674_v8 = vsel %vm572_vm1, %v654_v40, 0  ;;  %v761_v14 = vadd.f32 %v642_v62, %v641_v22  ;;  %vm743_vm11 = vweird.f32 %v1264_v61 }
 0x15e   : > { %725 = vmatpush.bf16.msrb.mxu3 %v674_v8 }
 0x15f   : > { %762 = vadd.xlane.f32.xlu1 %v761_v14 }
 0x160   : > { %v596_v24 = vpop.f32.mrf.mxu0  ;;  %v610_v56 = vpop.f32.mrf.mxu1 }
 0x161   : > { %v597_v45 = vadd.f32 %v596_v24, %v561_v13  ;;  %v611_v47 = vadd.f32 %v610_v56, %v561_v13  ;;  %1226 = vmatmul.msk.bf16.vlgmr.msrb.gmra.mxu3 %vm660_vm10, %v1237_v3  ;;  %v739_v13 = vmul.f32 256.0, %v1264_v61 }
 0x163   : > { %v645_v18 = vmax.f32 %v597_v45, 0.0  ;;  %v646_v32 = vmax.f32 %v611_v47, 0.0  ;;  %v740_v39 = vsub.f32 1.0, %v739_v13 }
 0x165   : > { %v651_v5 = vpack.c.bf16 %v645_v18, %v645_v18  ;;  %v652_v29 = vpack.c.bf16 %v646_v32, %v646_v32  ;;  %v741_v41 = vmul.f32 %v1264_v61, %v740_v39 }
 0x167   : > { %v665_v48 = vsel %vm572_vm1, %v651_v5, 0  ;;  %v668_v36 = vsel %vm572_vm1, %v652_v29, 0  ;;  %v742_v51 = vadd.f32 %v1264_v61, %v741_v41 }
 0x168   : > { %683 = vmatpush.bf16.msrb.mxu0 %v665_v48  ;;  %697 = vmatpush.bf16.msrb.mxu1 %v668_v36 }
 0x169   : > { %v1723_v52 = vsel %vm743_vm11, %v1264_v61, %v742_v51 }
 0x16b   : > { %1223 = vmatmul.msk.bf16.vlgmr.msrb.gmra.mxu0 %vm660_vm10, %v1237_v3  ;;  %1224 = vmatmul.msk.bf16.vlgmr.msrb.gmra.mxu1 %vm660_vm10, %v1237_v3 }
 0x1c8   : > { %v767_v57 = vpop.xlane.xlu2 %766 }
 0x1c9   : > { %v768_v58 = vmul.f32 %v767_v57, %v1723_v52 }
 0x1cb   : > { %v1726_v40 = vsub.f32 %v643_v31, %v768_v58  ;;  %v1728_v8 = vsub.f32 %v644_v11, %v768_v58 }
 0x1cd   : > { %v790_v3 = vmul.f32 %v1726_v40, %v1726_v40  ;;  %v791_v14 = vmul.f32 %v1728_v8, %v1728_v8 }
 0x1cf   : > { %v792_v24 = vadd.f32 %v791_v14, %v790_v3  ;;  %v747_v3 = vld [vmem:[%s2034_s5] sm:$0xff] }
 0x1d1   : > { %793 = vadd.xlane.f32.xlu2 %v792_v24 }
 0x1d2   : > { %v763_v56 = vpop.xlane.xlu1 %762 }
 0x1d3   : > { %v764_v45 = vmul.f32 %v763_v56, %v1723_v52 }
 0x1d5   : > { %v1735_v47 = vsub.f32 %v641_v22, %v764_v45  ;;  %v1737_v18 = vsub.f32 %v642_v62, %v764_v45 }
 0x1d7   : > { %v771_v31 = vmul.f32 %v1735_v47, %v1735_v47  ;;  %v772_v11 = vmul.f32 %v1737_v18, %v1737_v18 }
 0x1d9   : > { %v773_v32 = vadd.f32 %v772_v11, %v771_v31 }
 0x1db   : > { %774 = vadd.xlane.f32.xlu1 %v773_v32  ;;  %v713_v5 = vpop.f32.mrf.mxu2 }
 0x1e3   : > { %v715_v13 = vpop.f32.mrf.mxu2 }
 0x1e4   : > { %v727_v29 = vpop.f32.mrf.mxu3 }
 0x1e5   : > { %v732_v48 = vadd.f32 %v727_v29, %v713_v5  ;;  %v748_v29 = vld [vmem:[%s2034_s5 + $0x8] sm:$0xff] }
 0x1e7   : > { %733 = vadd.xlane.f32.xlu0 %v732_v48 }
 0x1e8   : > { %v685_v36 = vpop.f32.mrf.mxu0  ;;  %v699_v2 = vpop.f32.mrf.mxu1 }
 0x1e9   : > { %v751_v61 = vadd.f32 %v699_v2, %v685_v36 }
 0x1eb   : > { %752 = vadd.xlane.f32.xlu2 %v751_v61 }
 0x1ec   : > { %v729_v22 = vpop.f32.mrf.mxu3 }
 0x1ed   : > { %v735_v62 = vadd.f32 %v729_v22, %v715_v13 }
 0x1ef   : > { %736 = vadd.xlane.f32.xlu1 %v735_v62 }
 0x1f0   : > { %v687_v39 = vpop.f32.mrf.mxu0  ;;  %v701_v41 = vpop.f32.mrf.mxu1 }
 0x1f1   : > { %v754_v51 = vadd.f32 %v701_v41, %v687_v39 }
 0x1f3   : > { %755 = vadd.xlane.f32.xlu2 %v754_v51 }
 0x244   : > { %v794_v57 = vpop.xlane.xlu2 %793 }
 0x245   : > { %v795_v13 = vmul.f32 %v794_v57, %v1723_v52 }
 0x247   : > { %v796_v22 = vadd.f32 1e-05, %v795_v13 }
 0x249   : > { %1265 = vrsqrt.f32 %v796_v22  ;;  %vm803_vm13 = vweird.f32 %v796_v22 }
 0x24e   : > { %v775_v58 = vpop.xlane.xlu1 %774 }
 0x24f   : > { %v1266_v62 = vpop.eup %1265 }
 0x250   : > { %v798_v39 = vmul.f32 %v1266_v62, %v796_v22  ;;  %vm804_vm12 = vweird.f32 %v1266_v62 }
 0x251   : > { %vm805_vm14 = vmor %vm803_vm13, %vm804_vm12 }
 0x252   : > { %v799_v41 = vmul.f32 %v1266_v62, %v798_v39 }
 0x254   : > { %v800_v51 = vmul.f32 0.5, %v799_v41 }
 0x25a   : > { %v734_v14 = vpop.xlane.xlu0 %733 }
 0x25b   : > { %v745_v24 = vmul.f32 %v1723_v52, %v734_v14 }
 0x25d   : > { %v749_v56 = vadd.f32 %v747_v3, %v745_v24 }
 0x25e   : > { %v753_v45 = vpop.xlane.xlu2 %752 }
 0x25f   : > { %v757_v31 = vmul.f32 %v753_v45, %v1723_v52  ;;  %837 = vperm.xlu1 %1258, %v749_v56  }
 0x261   : > { %v759_v11 = vadd.f32 %v757_v31, %v747_v3  ;;  %v801_v3 = vsub.f32 1.5, %v800_v51 }
 0x262   : > { %v737_v32 = vpop.xlane.xlu1 %736 }
 0x263   : > { %832 = vperm.xlu0 %1257, %v759_v11   ;;  %v746_v5 = vmul.f32 %v1723_v52, %v737_v32  ;;  %v802_v14 = vmul.f32 %v1266_v62, %v801_v3 }
 0x265   : > { %v750_v2 = vadd.f32 %v748_v29, %v746_v5  ;;  %v806_v31 = vsel %vm805_vm14, %v1266_v62, %v802_v14  ;;  %v776_v5 = vmul.f32 %v775_v58, %v1723_v52 }
 0x266   : > { %v756_v48 = vpop.xlane.xlu2 %755 }
 0x267   : > { %v758_v36 = vmul.f32 %v756_v48, %v1723_v52 }
 0x269   : > { %v760_v61 = vadd.f32 %v758_v36, %v748_v29 }
 0x26b   : > { %846 = vperm.xlu2 %1256, %v760_v61   ;;  %851 = vperm.xlu0 %1257, %v750_v2  }
 0x2c5   : > { %v847_v57 = vpop.permute.xlu2 %846 }
 0x2d1   : > { %v838_v61 = vpop.permute.xlu1 %837 }
 0x2d2   : > { %v863_v22 = vmul.f32 %v838_v61, %v1737_v18  ;;  %v862_v62 = vmul.f32 %v838_v61, %v1735_v47  ;;  %v874_v47 = vld [vmem:[%s2036_s7] sm:$0x7] }
 0x2d5   : > { %v833_v24 = vpop.permute.xlu0 %832 }
 0x2d6   : > { %v864_v56 = vmul.f32 %v833_v24, %v1726_v40  ;;  %v865_v45 = vmul.f32 %v833_v24, %v1728_v8  ;;  %v777_v40 = vadd.f32 1e-05, %v776_v5 }
 0x2d8   : > { %v868_v11 = vmul.f32 %v864_v56, %v806_v31  ;;  %v869_v32 = vmul.f32 %v865_v45, %v806_v31  ;;  %1267 = vrsqrt.f32 %v777_v40  ;;  %vm784_vm10 = vweird.f32 %v777_v40 }
 0x2da   : > { %v1757_v29 = vadd.f32 %v868_v11, %v847_v57  ;;  %v1759_v48 = vadd.f32 %v869_v32, %v847_v57 }
 0x2dc   : > { %977 = vrot.lane.b32.xlu1 %v1759_v48, %s1287_s17  ;;  %993 = vrot.lane.b32.xlu0 %v1759_v48, %s1285_s15 }
 0x2dd   : > { %991 = vrot.lane.b32.xlu2 %v1757_v29, %s1285_s15  ;;  %v852_v41 = vpop.permute.xlu0 %851 }
 0x2de   : > { %v1268_v52 = vpop.eup %1267 }
 0x2df   : > { %v779_v8 = vmul.f32 %v1268_v52, %v777_v40  ;;  %vm785_vm15 = vweird.f32 %v1268_v52 }
 0x2e0   : > { %vm786_vm11 = vmor %vm784_vm10, %vm785_vm15 }
 0x2e1   : > { %v780_v58 = vmul.f32 %v1268_v52, %v779_v8 }
 0x2e3   : > { %v781_v36 = vmul.f32 0.5, %v780_v58 }
 0x2e4   : > { %961 = vrot.lane.b32.xlu0 %v1759_v48, %s1286_s16  ;;  %975 = vrot.lane.b32.xlu1 %v1757_v29, %s1287_s17 }
 0x2e5   : > { %959 = vrot.lane.b32.xlu2 %v1757_v29, %s1286_s16  ;;  %v782_v2 = vsub.f32 1.5, %v781_v36 }
 0x2e7   : > { %v783_v13 = vmul.f32 %v1268_v52, %v782_v2 }
 0x2e9   : > { %v787_v39 = vsel %vm786_vm11, %v1268_v52, %v783_v13 }
 0x2ea   : > { %v867_v51 = vmul.f32 %v863_v22, %v787_v39  ;;  %v866_v3 = vmul.f32 %v862_v62, %v787_v39 }
 0x2ec   : > { %913 = vrot.lane.b32.xlu0 %v1759_v48, %s1289_s19  ;;  %943 = vrot.lane.b32.xlu1 %v1757_v29, %s1288_s18  ;;  %v1793_v14 = vadd.f32 %v867_v51, %v852_v41  ;;  %v1795_v18 = vadd.f32 %v866_v3, %v852_v41 }
 0x2ed   : > { %945 = vrot.lane.b32.xlu2 %v1759_v48, %s1288_s18 }
 0x2f4   : > { %879 = vrot.lane.b32.xlu0 %v1757_v29, %s1291_s21  ;;  %911 = vrot.lane.b32.xlu1 %v1757_v29, %s1289_s19 }
 0x2f5   : > { %927 = vrot.lane.b32.xlu2 %v1757_v29, %s1290_s20 }
 0x2fc   : > { %897 = vrot.lane.b32.xlu0 %v1759_v48, %s1292_s22  ;;  %929 = vrot.lane.b32.xlu1 %v1759_v48, %s1290_s20 }
 0x2fd   : > { %881 = vrot.lane.b32.xlu2 %v1759_v48, %s1291_s21 }
 0x304   : > { %895 = vrot.lane.b32.xlu1 %v1757_v29, %s1292_s22  ;;  %989 = vrot.lane.b32.xlu0 %v1793_v14, %s1285_s15 }
 0x305   : > { %971 = vrot.lane.b32.xlu2 %v1795_v18, %s1287_s17 }
 0x30c   : > { %939 = vrot.lane.b32.xlu0 %v1795_v18, %s1288_s18  ;;  %987 = vrot.lane.b32.xlu1 %v1795_v18, %s1285_s15 }
 0x30d   : > { %973 = vrot.lane.b32.xlu2 %v1793_v14, %s1287_s17 }
 0x314   : > { %957 = vrot.lane.b32.xlu0 %v1793_v14, %s1286_s16  ;;  %955 = vrot.lane.b32.xlu1 %v1795_v18, %s1286_s16 }
 0x315   : > { %925 = vrot.lane.b32.xlu2 %v1793_v14, %s1290_s20 }
 0x31c   : > { %909 = vrot.lane.b32.xlu0 %v1793_v14, %s1289_s19  ;;  %941 = vrot.lane.b32.xlu1 %v1793_v14, %s1288_s18 }
 0x31d   : > { %877 = vrot.lane.b32.xlu2 %v1793_v14, %s1291_s21 }
 0x324   : > { %907 = vrot.lane.b32.xlu0 %v1795_v18, %s1289_s19  ;;  %893 = vrot.lane.b32.xlu1 %v1793_v14, %s1292_s22  ;;  %s1234_s19 = sshll.u32 %s2044_s10, 3 }
 0x325   : > { %923 = vrot.lane.b32.xlu2 %v1795_v18, %s1290_s20  ;;  %s340_s12 = scalar_lea.vmem %s2037_s8, %s1234_s19 }
 0x32c   : > { %891 = vrot.lane.b32.xlu0 %v1795_v18, %s1292_s22  ;;  %875 = vrot.lane.b32.xlu1 %v1795_v18, %s1291_s21  ;;  %s345_s22 = scalar_lea.vmem %s2038_s9, %s1234_s19 }
 0x32d   : > { %1026 = vperm.xlu2 %1256, %v874_v47  }
 0x337   : > { %v992_v24 = vpop.permute.xlu2 %991 }
 0x33f   : > { %v960_v56 = vpop.permute.xlu2 %959 }
 0x347   : > { %v1834_v45 = vpop.permute.xlu2 %945 }
 0x34e   : > { %v978_v31 = vpop.permute.xlu1 %977  ;;  %v994_v11 = vpop.permute.xlu0 %993 }
 0x34f   : > { %v995_v32 = vsel %vm518_vm0, %v992_v24, %v994_v11  ;;  %v1840_v52 = vpop.permute.xlu2 %927 }
 0x350   : > { %v1001_v57 = vmul.f32 %v1448_v16, %v995_v32 }
 0x352   : > { %v1021_v5 = vpack.c.bf16 %v1001_v57, %v1001_v57 }
 0x354   : > { %v1039_v40 = vsel %vm572_vm1, %v1021_v5, 0 }
 0x355   : > { %1073 = vmatpush.bf16.msra.mxu2 %v1039_v40 }
 0x356   : > { %v976_v8 = vpop.permute.xlu1 %975  ;;  %v962_v58 = vpop.permute.xlu0 %961 }
 0x357   : > { %v979_v36 = vsel %vm497_vm3, %v976_v8, %v978_v31  ;;  %v963_v2 = vsel %vm476_vm2, %v960_v56, %v962_v58  ;;  %v1854_v39 = vpop.permute.xlu2 %881 }
 0x358   : > { %v985_v61 = vmul.f32 %v979_v36, %v504_v26  ;;  %v969_v16 = vmul.f32 %v963_v2, %v483_v25 }
 0x35a   : > { %v1017_v13 = vpack.c.bf16 %v985_v61, %v969_v16 }
 0x35c   : > { %1074 = vmatpush.bf16.msra.mxu2 %v1017_v13 }
 0x35e   : > { %v1850_v22 = vpop.permute.xlu1 %943  ;;  %v1852_v62 = vpop.permute.xlu0 %913 }
 0x35f   : > { %v947_v41 = vsel %vm455_vm4, %v1850_v22, %v1834_v45  ;;  %v972_v47 = vpop.permute.xlu2 %971 }
 0x360   : > { %v953_v51 = vmul.f32 %v947_v41, %v462_v43 }
 0x362   : > { %v1013_v26 = vpack.c.bf16 %v953_v51, %v1757_v29 }
 0x364   : > { %1075 = vmatpush.bf16.msra.mxu2 %v1013_v26 }
 0x366   : > { %v912_v25 = vpop.permute.xlu1 %911  ;;  %v1863_v3 = vpop.permute.xlu0 %879 }
 0x367   : > { %v974_v5 = vpop.permute.xlu2 %973 }
 0x36e   : > { %v1865_v32 = vpop.permute.xlu1 %929  ;;  %v1867_v57 = vpop.permute.xlu0 %897 }
 0x36f   : > { %v1875_v16 = vpop.permute.xlu2 %925 }
 0x376   : > { %v1869_v40 = vpop.permute.xlu1 %895  ;;  %v990_v36 = vpop.permute.xlu0 %989 }
 0x377   : > { %v996_v2 = vsel %vm518_vm0, %v990_v36, %v992_v24 }
 0x378   : > { %v1000_v43 = vmul.f32 %v1523_v55, %v996_v2  ;;  %v982_v2 = vsel %vm497_vm3, %v978_v31, %v972_v47 }
 0x37a   : > { %v1020_v61 = vpack.c.bf16 %v1000_v43, %v1000_v43  ;;  %v981_v43 = vsel %vm497_vm3, %v972_v47, %v974_v5  ;;  %v1897_v47 = vpop.permute.xlu2 %877 }
 0x37c   : > { %v1036_v29 = vsel %vm572_vm1, %v1020_v61, 0  ;;  %v980_v61 = vsel %vm497_vm3, %v974_v5, %v976_v8 }
 0x37d   : > { %1060 = vmatpush.bf16.msra.mxu1 %v1036_v29 }
 0x37e   : > { %v988_v13 = vpop.permute.xlu1 %987  ;;  %v940_v41 = vpop.permute.xlu0 %939 }
 0x37f   : > { %v997_v51 = vsel %vm518_vm0, %v988_v13, %v990_v36  ;;  %v998_v26 = vsel %vm518_vm0, %v994_v11, %v988_v13  ;;  %v984_v11 = vmul.f32 %v980_v61, %v503_v60 }
 0x380   : > { %v999_v4 = vmul.f32 %v1518_v54, %v997_v51  ;;  %v1002_v24 = vmul.f32 %v1439_v9, %v998_v26  ;;  %v986_v9 = vmul.f32 %v982_v2, %v505_v30  ;;  %v983_v54 = vmul.f32 %v981_v43, %v502_v59 }
 0x381   : > { %v950_v30 = vsel %vm455_vm4, %v1834_v45, %v940_v41 }
 0x382   : > { %v1019_v33 = vpack.c.bf16 %v999_v4, %v999_v4  ;;  %v1022_v55 = vpack.c.bf16 %v1002_v24, %v1002_v24  ;;  %v954_v45 = vmul.f32 %v950_v30, %v463_v44  ;;  %v899_v44 = vsel %vm392_vm8, %v1869_v40, %v1867_v57 }
 0x384   : > { %v1033_v36 = vsel %vm572_vm1, %v1019_v33, 0  ;;  %v1042_v29 = vsel %vm572_vm1, %v1022_v55, 0  ;;  %v1014_v61 = vpack.c.bf16 %v954_v45, %v1759_v48  ;;  %v883_v48 = vsel %vm371_vm7, %v1863_v3, %v1854_v39 }
 0x385   : > { %1047 = vmatpush.bf16.msra.mxu0 %v1033_v36  ;;  %1086 = vmatpush.bf16.msra.mxu3 %v1042_v29 }
 0x386   : > { %v956_v4 = vpop.permute.xlu1 %955  ;;  %v958_v31 = vpop.permute.xlu0 %957 }
 0x387   : > { %v966_v33 = vsel %vm476_vm2, %v962_v58, %v956_v4  ;;  %v964_v8 = vsel %vm476_vm2, %v958_v31, %v960_v56  ;;  %v965_v5 = vsel %vm476_vm2, %v956_v4, %v958_v31  ;;  %v931_v56 = vsel %vm434_vm6, %v1840_v52, %v1865_v32 }
 0x388   : > { %v970_v59 = vmul.f32 %v966_v33, %v484_v28  ;;  %v967_v60 = vmul.f32 %v965_v5, %v481_v63  ;;  %v968_v13 = vmul.f32 %v964_v8, %v482_v6  ;;  %v932_v28 = vsel %vm434_vm6, %v1875_v16, %v1840_v52 }
 0x389   : > { %v915_v63 = vsel %vm413_vm5, %v912_v25, %v1852_v62  ;;  %v938_v6 = vmul.f32 %v931_v56, %v442_v20  ;;  %v937_v20 = vmul.f32 %v932_v28, %v441_v1  ;;  %v906_v1 = vmul.f32 %v899_v44, %v400_v12 }
 0x38a   : > { %v1015_v58 = vpack.c.bf16 %v983_v54, %v967_v60  ;;  %v1016_v51 = vpack.c.bf16 %v984_v11, %v968_v13  ;;  %v1018_v26 = vpack.c.bf16 %v986_v9, %v970_v59  ;;  %v890_v54 = vmul.f32 %v883_v48, %v379_v10 }
 0x38b   : > { %v2041_v13 = vperm.slane %v1581_v42, 1 }
 0x38c   : > { %1048 = vmatpush.bf16.msra.mxu0 %v1015_v58  ;;  %1061 = vmatpush.bf16.msra.mxu1 %v1016_v51  ;;  %v1006_v31 = vpack.c.bf16 %v906_v1, %v890_v54  ;;  %v2042_v58 = vperm.slane %v1591_v49, 1 }
 0x38d   : > { %1087 = vmatpush.bf16.msra.mxu3 %v1018_v26 }
 0x38e   : > { %v942_v24 = vpop.permute.xlu1 %941  ;;  %v910_v55 = vpop.permute.xlu0 %909 }
 0x38f   : > { %v948_v2 = vsel %vm455_vm4, %v942_v24, %v1850_v22  ;;  %v949_v52 = vsel %vm455_vm4, %v940_v41, %v942_v24  ;;  %v916_v43 = vsel %vm413_vm5, %v910_v55, %v912_v25  ;;  %v922_v41 = vmul.f32 %v915_v63, %v421_v19  ;;  %v924_v25 = vpop.permute.xlu2 %923 }
 0x390   : > { %v951_v36 = vmul.f32 %v949_v52, %v460_v46  ;;  %v952_v29 = vmul.f32 %v948_v2, %v461_v50  ;;  %v921_v22 = vmul.f32 %v916_v43, %v420_v0  ;;  %v884_v0 = vsel %vm371_vm7, %v1897_v47, %v1863_v3 }
 0x391   : > { %1088 = vmatpush.bf16.msra.mxu3 %v1014_v61  ;;  %v1010_v19 = vpack.c.bf16 %v938_v6, %v922_v41  ;;  %v934_v4 = vsel %vm434_vm6, %v1865_v32, %v924_v25  ;;  %v933_v12 = vsel %vm434_vm6, %v924_v25, %v1875_v16 }
 0x392   : > { %v1011_v46 = vpack.c.bf16 %v951_v36, %v1795_v18  ;;  %v1012_v50 = vpack.c.bf16 %v952_v29, %v1793_v14  ;;  %v1009_v9 = vpack.c.bf16 %v937_v20, %v921_v22  ;;  %v889_v14 = vmul.f32 %v884_v0, %v378_v37 }
 0x393   : > { %v935_v23 = vmul.f32 %v934_v4, %v439_v34  ;;  %v936_v37 = vmul.f32 %v933_v12, %v440_v15 }
 0x394   : > { %1049 = vmatpush.bf16.msra.mxu0 %v1011_v46  ;;  %1062 = vmatpush.bf16.msra.mxu1 %v1012_v50 }
 0x395   : > { %1076 = vmatpush.bf16.msra.mxu2 %v1009_v9  ;;  %1089 = vmatpush.bf16.msra.mxu3 %v1010_v19 }
 0x396   : > { %v894_v18 = vpop.permute.xlu1 %893  ;;  %v908_v3 = vpop.permute.xlu0 %907 }
 0x397   : > { %v900_v10 = vsel %vm392_vm8, %v894_v18, %v1869_v40  ;;  %v917_v32 = vsel %vm413_vm5, %v908_v3, %v910_v55  ;;  %v918_v16 = vsel %vm413_vm5, %v1852_v62, %v908_v3  ;;  %v1023_v40 = vld [vmem:[%s2035_s6] sm:$0x3]  ;;  %v1027_v7 = vpop.permute.xlu2 %1026 }
 0x398   : > { %v905_v11 = vmul.f32 %v900_v10, %v399_v38  ;;  %v919_v34 = vmul.f32 %v918_v16, %v418_v27  ;;  %v920_v33 = vmul.f32 %v917_v32, %v419_v53 }
 0x399   : > { %1090 = vmatpush.bf16.msra.mxu3 %v1006_v31 }
 0x39a   : > { %v1007_v8 = vpack.c.bf16 %v935_v23, %v919_v34  ;;  %v1008_v5 = vpack.c.bf16 %v936_v37, %v920_v33  ;;  %v1005_v62 = vpack.c.bf16 %v905_v11, %v889_v14 }
 0x39c   : > { %1230 = vmatmul.msk.bf16.vlgmr.msra.gmra.mxu3 %vm568_vm9, %v1023_v40  ;;  %1050 = vmatpush.bf16.msra.mxu0 %v1007_v8 }
 0x39d   : > { %1063 = vmatpush.bf16.msra.mxu1 %v1008_v5  ;;  %1077 = vmatpush.bf16.msra.mxu2 %v1005_v62 }
 0x39e   : > { %v876_v21 = vpop.permute.xlu1 %875  ;;  %v892_v38 = vpop.permute.xlu0 %891 }
 0x39f   : > { %v885_v27 = vsel %vm371_vm7, %v876_v21, %v1897_v47  ;;  %v886_v53 = vsel %vm371_vm7, %v1854_v39, %v876_v21  ;;  %v901_v15 = vsel %vm392_vm8, %v892_v38, %v894_v18  ;;  %v902_v30 = vsel %vm392_vm8, %v1867_v57, %v892_v38 }
 0x3a0   : > { %v887_v59 = vmul.f32 %v886_v53, %v376_v35  ;;  %v888_v60 = vmul.f32 %v885_v27, %v377_v17  ;;  %v903_v47 = vmul.f32 %v902_v30, %v2041_v13  ;;  %v904_v51 = vmul.f32 %v901_v15, %v2042_v58  ;;  %1229 = vmatmul.msk.bf16.vlgmr.msra.gmra.mxu2 %vm568_vm9, %v1023_v40 }
 0x3a2   : > { %v1003_v39 = vpack.c.bf16 %v903_v47, %v887_v59  ;;  %v1004_v26 = vpack.c.bf16 %v904_v51, %v888_v60 }
 0x3a4   : > { %1051 = vmatpush.bf16.msra.mxu0 %v1003_v39  ;;  %1064 = vmatpush.bf16.msra.mxu1 %v1004_v26 }
 0x3a7   : > { %1227 = vmatmul.msk.bf16.vlgmr.msra.gmra.mxu0 %vm568_vm9, %v1023_v40  ;;  %1228 = vmatmul.msk.bf16.vlgmr.msra.gmra.mxu1 %vm568_vm9, %v1023_v40 }
 0x41f   : > { %v1092_v35 = vpop.f32.mrf.mxu3 }
 0x420   : > { %v1093_v17 = vadd.f32 %v1092_v35, %v1027_v7 }
 0x422   : > { %1269 = vtanh.f32 %v1093_v17 }
 0x423   : > { %v1079_v42 = vpop.f32.mrf.mxu2 }
 0x424   : > { %v1080_v57 = vadd.f32 %v1079_v42, %v1027_v7  ;;  %v1053_v56 = vpop.f32.mrf.mxu0  ;;  %v1066_v49 = vpop.f32.mrf.mxu1 }
 0x425   : > { %v1067_v45 = vadd.f32 %v1066_v49, %v1027_v7  ;;  %v1054_v28 = vadd.f32 %v1053_v56, %v1027_v7 }
 0x426   : > { %1271 = vtanh.f32 %v1080_v57 }
 0x427   : > { %v1094_v63 = vpop.f32.mrf.mxu3  ;;  %1273 = vtanh.f32 %v1067_v45 }
 0x428   : > { %v1270_v6 = vpop.eup %1269  ;;  %1275 = vtanh.f32 %v1054_v28 }
 0x429   : > { %v1108_v44 = vrot.slane %v1270_v6, 4 }
 0x42b   : > { %v1081_v24 = vpop.f32.mrf.mxu2 }
 0x42c   : > { %v1272_v55 = vpop.eup %1271  ;;  %v1068_v2 = vpop.f32.mrf.mxu1 }
 0x42d   : > { %v1055_v52 = vpop.f32.mrf.mxu0  ;;  %v1109_v43 = vsel %vm572_vm1, %v1272_v55, %v1108_v44  ;;  %v1274_v61 = vpop.eup %1273 }
 0x42e   : > { %1111 = vst [vmem:[%s345_s22] sm:$0x77] %v1109_v43  ;;  %v1102_v20 = vrot.slane %v1274_v61, 4  ;;  %v1276_v36 = vpop.eup %1275 }
 0x430   : > { %v1103_v29 = vsel %vm572_vm1, %v1276_v36, %v1102_v20 }
 0x431   : > { %1105 = vst [vmem:[%s340_s12] sm:$0x77] %v1103_v29 }
 0x432 PF: > { %s20_s30 = sadd.s32 1, %s1283_s30  }
 0x433   : > { %p17_p4 = scmp.ge.s32.totalorder %s20_s30, 4  }
 0x435   :  { %19 = sbr.rel (!%p17_p4) target bundleno = 1 (0x1), region = 94 }

</bundles_post_ra>
